<compile_context>
chip_gen: v6e
topology: v6e:2x2x1
jax: 0.10.0
libtpu: 0.0.40
codegen_flags: <defaults>
</compile_context>

<pallas_src>
import jax
import jax.numpy as jnp
from jax.experimental import pallas as pl
from jax.experimental.pallas import tpu as pltpu


def _fused_convnet_kernel(x_ref, wb1_ref, b1_ref, wb2_ref, b2_ref, o_ref,
                          xp_ref, hp_ref):
    # x_ref  : (N, H, W*Cin)        input rows, W and Cin merged on the lane axis
    # wb1_ref: (3, W*Cin, W*Cmid)   banded conv1 weights (one band per ky), bf16
    # b1_ref : (1, W*Cmid)          conv1 bias tiled over W, f32
    # wb2_ref: (3, W*Cmid, W*Cout)  banded conv2 weights, bf16
    # b2_ref : (1, W*Cout)          conv2 bias tiled over W, f32
    # o_ref  : (N*H, W*Cout)        lane-dense output slab
    # xp_ref : (N, H+2, W*Cin)      VMEM scratch: H-zero-padded input rows
    # hp_ref : (N, H+2, W*Cmid)     VMEM scratch: H-zero-padded intermediate
    N, H, WCin = x_ref.shape
    WCmid = hp_ref.shape[2]
    WCout = o_ref.shape[1]

    # In-kernel zero padding of the H border (the W border is folded into the
    # banded weight matrices, so no W padding is needed anywhere).
    xp_ref[...] = jnp.zeros_like(xp_ref)
    xp_ref[:, 1:H + 1, :] = x_ref[...]

    # conv1 + bias + ReLU: 3 banded matmuls (ky = 0, 1, 2), bf16 MXU, f32 acc.
    acc1 = jnp.zeros((N * H, WCmid), jnp.float32)
    for ky in range(3):
        rows = xp_ref[:, ky:ky + H, :].reshape(N * H, WCin)
        acc1 = acc1 + jnp.dot(rows.astype(jnp.bfloat16), wb1_ref[ky],
                              preferred_element_type=jnp.float32)
    h = jnp.maximum(acc1 + b1_ref[...], 0.0)           # f32 epilogue on the VPU

    # Intermediate activation stays in VMEM; re-pad its H border for conv2.
    hp_ref[...] = jnp.zeros_like(hp_ref)
    hp_ref[:, 1:H + 1, :] = h.reshape(N, H, WCmid)

    # conv2 + bias.
    acc2 = jnp.zeros((N * H, WCout), jnp.float32)
    for ky in range(3):
        rows = hp_ref[:, ky:ky + H, :].reshape(N * H, WCmid)
        acc2 = acc2 + jnp.dot(rows.astype(jnp.bfloat16), wb2_ref[ky],
                              preferred_element_type=jnp.float32)
    o_ref[...] = (acc2 + b2_ref[...]).astype(o_ref.dtype)


def _banded_weights(w_hwio, W):
    """Fold the kx taps + W-dim 'SAME' zero padding of a 3x3 conv into banded
    matrices:  wb[ky][xi*Cin+ci, xo*Cout+co] = w[ky, xi-xo+1, ci, co]  (0 outside
    the band), so conv output row y = sum_ky  x_row_padded[y+ky] @ wb[ky]."""
    _, _, Cin, Cout = w_hwio.shape
    xi = jnp.arange(W)[:, None]                      # input column index
    xo = jnp.arange(W)[None, :]                      # output column index
    kx = xi - xo + 1                                 # (W, W) tap index
    valid = (kx >= 0) & (kx <= 2)
    band = w_hwio[:, jnp.clip(kx, 0, 2)]             # (3, W, W, Cin, Cout)
    band = jnp.where(valid[None, :, :, None, None], band, 0.0)
    band = band.transpose(0, 1, 3, 2, 4)             # (3, W, Cin, W, Cout)
    return band.reshape(3, W * Cin, W * Cout)


@jax.jit
def abstract_net_forward(params, x_nchw):
    w1, b1, w2, b2 = params["w1"], params["b1"], params["w2"], params["b2"]
    N, Cin, H, W = x_nchw.shape
    Cmid, Cout = w1.shape[-1], w2.shape[-1]

    # Wrapper-side layout plumbing (free): NCHW -> (N, H, W*Cin) row slabs.
    x_rows = jnp.transpose(x_nchw, (0, 2, 3, 1)).reshape(N, H, W * Cin)

    # Weight / bias preprocessing (in a real model this happens once).
    wb1 = _banded_weights(w1, W).astype(jnp.bfloat16)     # (3, W*Cin,  W*Cmid)
    wb2 = _banded_weights(w2, W).astype(jnp.bfloat16)     # (3, W*Cmid, W*Cout)
    b1t = jnp.tile(b1, W).reshape(1, W * Cmid)
    b2t = jnp.tile(b2, W).reshape(1, W * Cout)

    y2d = pl.pallas_call(
        _fused_convnet_kernel,
        out_shape=jax.ShapeDtypeStruct((N * H, W * Cout), x_nchw.dtype),
        grid_spec=pltpu.PrefetchScalarGridSpec(
            num_scalar_prefetch=0,
            grid=(1,),                    # single invocation: whole batch at once
            in_specs=[
                pl.BlockSpec((N, H, W * Cin), lambda i: (0, 0, 0)),
                pl.BlockSpec((3, W * Cin, W * Cmid), lambda i: (0, 0, 0)),
                pl.BlockSpec((1, W * Cmid), lambda i: (0, 0)),
                pl.BlockSpec((3, W * Cmid, W * Cout), lambda i: (0, 0, 0)),
                pl.BlockSpec((1, W * Cout), lambda i: (0, 0)),
            ],
            out_specs=pl.BlockSpec((N * H, W * Cout), lambda i: (0, 0)),
            scratch_shapes=[
                pltpu.VMEM((N, H + 2, W * Cin), jnp.float32),
                pltpu.VMEM((N, H + 2, W * Cmid), jnp.float32),
            ],
        ),
        # Single grid step here; at realistic H the M (=N*H) dimension would be
        # tiled with a leading "parallel" axis to shard across v7x's 2 TCs and
        # keep double-buffered blocks within v7x's smaller VMEM.
        compiler_params=pltpu.CompilerParams(
            dimension_semantics=("arbitrary",)),
    )(x_rows, wb1, b1t, wb2, b2t)

    # Wrapper-side reshape back to the PyTorch NCHW output convention.
    return jnp.transpose(y2d.reshape(N, H, W, Cout), (0, 3, 1, 2))


class AbstractNetPallas:
    """Pallas analogue of AbstractNet(model): forward delegates to the network."""

    def __init__(self, params):
        self.params = params
        self.params_group = {}
        self.savepoint = None

    def set_params_group(self, params_group):
        self.params_group = params_group

    def get_trainable_parameters(self, lr=None):
        return self.params_group if self.params_group else self.params

    def forward(self, x_nchw):
        return abstract_net_forward(self.params, x_nchw)

    __call__ = forward


def _reference_forward(x_nchw, params):
    """Pure-JAX lax-conv reference.  Operands are rounded to bf16 exactly like
    the kernel's MXU path (f32 accumulation), so the comparison is tight."""
    def r(a):
        return a.astype(jnp.bfloat16).astype(jnp.float32)
    dn = ("NHWC", "HWIO", "NHWC")
    x = jnp.transpose(x_nchw, (0, 2, 3, 1))
    h = jax.lax.conv_general_dilated(r(x), r(params["w1"]), (1, 1), "SAME",
                                     dimension_numbers=dn) + params["b1"]
    h = jnp.maximum(h, 0.0)
    y = jax.lax.conv_general_dilated(r(h), r(params["w2"]), (1, 1), "SAME",
                                     dimension_numbers=dn) + params["b2"]
    return jnp.transpose(y, (0, 3, 1, 2))


def _init_params(key):
    k1, k2, k3, k4 = jax.random.split(key, 4)
    c_in, c_mid, c_out = 4, 8, 4
    s1 = 1.0 / jnp.sqrt(9.0 * c_in)
    s2 = 1.0 / jnp.sqrt(9.0 * c_mid)
    return {
        "w1": jax.random.uniform(k1, (3, 3, c_in, c_mid), jnp.float32, -s1, s1),
        "b1": jax.random.uniform(k2, (c_mid,), jnp.float32, -s1, s1),
        "w2": jax.random.uniform(k3, (3, 3, c_mid, c_out), jnp.float32, -s2, s2),
        "b2": jax.random.uniform(k4, (c_out,), jnp.float32, -s2, s2),
    }


if __name__ == "__main__":
    key = jax.random.PRNGKey(0)
    pkey, xkey = jax.random.split(key)
    params = _init_params(pkey)

    # PyTorch-convention NCHW input: batch=2, channels=4, spatial=16x16.
    x = jax.random.normal(xkey, (2, 4, 16, 16), jnp.float32)

    net = AbstractNetPallas(params)
    out = jax.block_until_ready(net(x))

    ref = jax.block_until_ready(_reference_forward(x, params))
    assert out.shape == ref.shape == (2, 4, 16, 16)
    # bf16 matmul operands (f32 accumulation) -> compare at bf16-level tolerance.
    assert jnp.allclose(out, ref, atol=2e-3, rtol=2e-3), \
        float(jnp.max(jnp.abs(out - ref)))

    print("KERNEL_OK")
</pallas_src>

<mosaic_0001>
module attributes {stable_mosaic.version = 11 : i64} {
  func.func @_fused_convnet_kernel(%arg0: i32, %arg1: memref<2x16x64xf32, #tpu.memory_space<vmem>>, %arg2: memref<3x64x128xbf16, #tpu.memory_space<vmem>>, %arg3: memref<1x128xf32, #tpu.memory_space<vmem>>, %arg4: memref<3x128x64xbf16, #tpu.memory_space<vmem>>, %arg5: memref<1x64xf32, #tpu.memory_space<vmem>>, %arg6: memref<32x64xf32, #tpu.memory_space<vmem>>, %arg7: memref<2x18x64xf32, #tpu.memory_space<vmem>>, %arg8: memref<2x18x128xf32, #tpu.memory_space<vmem>>) attributes {dimension_semantics = [#tpu.dimension_semantics<arbitrary>], iteration_bounds = array<i64: 1>, scalar_prefetch = 0 : i64, scratch_operands = 2 : i64, tpu.core_type = #tpu.core_type<tc>, window_params = [{pipeline_mode = #tpu.pipeline_mode<synchronous>, transform_indices = @transform_0, window_bounds = array<i64: 2, 16, 64>}, {pipeline_mode = #tpu.pipeline_mode<synchronous>, transform_indices = @transform_1, window_bounds = array<i64: 3, 64, 128>}, {pipeline_mode = #tpu.pipeline_mode<synchronous>, transform_indices = @transform_2, window_bounds = array<i64: 1, 128>}, {pipeline_mode = #tpu.pipeline_mode<synchronous>, transform_indices = @transform_3, window_bounds = array<i64: 3, 128, 64>}, {pipeline_mode = #tpu.pipeline_mode<synchronous>, transform_indices = @transform_4, window_bounds = array<i64: 1, 64>}, {pipeline_mode = #tpu.pipeline_mode<synchronous>, transform_indices = @transform_5, window_bounds = array<i64: 32, 64>}]} {
    %cst = arith.constant 0.000000e+00 : f32
    %0 = vector.broadcast %cst : f32 to vector<2x18x64xf32>
    %c0 = arith.constant 0 : index
    %c0_0 = arith.constant 0 : index
    %c0_1 = arith.constant 0 : index
    %1 = vector.load %arg7[%c0, %c0_0, %c0_1] : memref<2x18x64xf32, #tpu.memory_space<vmem>>, vector<2x18x64xf32>
    tpu.vector_store %arg7[%c0, %c0_0, %c0_1], %0 {strides = array<i32>} : memref<2x18x64xf32, #tpu.memory_space<vmem>>, vector<2x18x64xf32>,
    %c0_2 = arith.constant 0 : index
    %c0_3 = arith.constant 0 : index
    %c0_4 = arith.constant 0 : index
    %2 = vector.load %arg1[%c0_2, %c0_3, %c0_4] : memref<2x16x64xf32, #tpu.memory_space<vmem>>, vector<2x16x64xf32>
    %c0_5 = arith.constant 0 : index
    %c1 = arith.constant 1 : index
    %c0_6 = arith.constant 0 : index
    %3 = vector.load %arg7[%c0_5, %c1, %c0_6] : memref<2x18x64xf32, #tpu.memory_space<vmem>>, vector<2x16x64xf32>
    tpu.vector_store %arg7[%c0_5, %c1, %c0_6], %2 {strides = array<i32>} : memref<2x18x64xf32, #tpu.memory_space<vmem>>, vector<2x16x64xf32>,
    %cst_7 = arith.constant 0.000000e+00 : f32
    %4 = vector.broadcast %cst_7 : f32 to vector<32x128xf32>
    %c0_8 = arith.constant 0 : index
    %c0_9 = arith.constant 0 : index
    %c0_10 = arith.constant 0 : index
    %5 = vector.load %arg7[%c0_8, %c0_9, %c0_10] : memref<2x18x64xf32, #tpu.memory_space<vmem>>, vector<2x16x64xf32>
    %6 = vector.shape_cast %5 : vector<2x16x64xf32> to vector<32x64xf32>
    %7 = arith.truncf %6 : vector<32x64xf32> to vector<32x64xbf16>
    %c0_11 = arith.constant 0 : index
    %c0_12 = arith.constant 0 : index
    %c0_13 = arith.constant 0 : index
    %8 = vector.load %arg2[%c0_11, %c0_12, %c0_13] : memref<3x64x128xbf16, #tpu.memory_space<vmem>>, vector<1x64x128xbf16>
    %9 = vector.shape_cast %8 : vector<1x64x128xbf16> to vector<64x128xbf16>
    %cst_14 = arith.constant dense<0.000000e+00> : vector<32x128xf32>
    %10 = tpu.matmul %7, %9, %cst_14 {dimension_numbers = #tpu.dot_dimension_numbers<[1], [0], [0], [1], [0, 0, 1, 1], [], []>} : vector<32x64xbf16>, vector<64x128xbf16>, vector<32x128xf32> -> vector<32x128xf32>
    %11 = arith.addf %4, %10 : vector<32x128xf32>
    %c0_15 = arith.constant 0 : index
    %c1_16 = arith.constant 1 : index
    %c0_17 = arith.constant 0 : index
    %12 = vector.load %arg7[%c0_15, %c1_16, %c0_17] : memref<2x18x64xf32, #tpu.memory_space<vmem>>, vector<2x16x64xf32>
    %13 = vector.shape_cast %12 : vector<2x16x64xf32> to vector<32x64xf32>
    %14 = arith.truncf %13 : vector<32x64xf32> to vector<32x64xbf16>
    %c1_18 = arith.constant 1 : index
    %c0_19 = arith.constant 0 : index
    %c0_20 = arith.constant 0 : index
    %15 = vector.load %arg2[%c1_18, %c0_19, %c0_20] : memref<3x64x128xbf16, #tpu.memory_space<vmem>>, vector<1x64x128xbf16>
    %16 = vector.shape_cast %15 : vector<1x64x128xbf16> to vector<64x128xbf16>
    %cst_21 = arith.constant dense<0.000000e+00> : vector<32x128xf32>
    %17 = tpu.matmul %14, %16, %cst_21 {dimension_numbers = #tpu.dot_dimension_numbers<[1], [0], [0], [1], [0, 0, 1, 1], [], []>} : vector<32x64xbf16>, vector<64x128xbf16>, vector<32x128xf32> -> vector<32x128xf32>
    %18 = arith.addf %11, %17 : vector<32x128xf32>
    %c0_22 = arith.constant 0 : index
    %c2 = arith.constant 2 : index
    %c0_23 = arith.constant 0 : index
    %19 = vector.load %arg7[%c0_22, %c2, %c0_23] : memref<2x18x64xf32, #tpu.memory_space<vmem>>, vector<2x16x64xf32>
    %20 = vector.shape_cast %19 : vector<2x16x64xf32> to vector<32x64xf32>
    %21 = arith.truncf %20 : vector<32x64xf32> to vector<32x64xbf16>
    %c2_24 = arith.constant 2 : index
    %c0_25 = arith.constant 0 : index
    %c0_26 = arith.constant 0 : index
    %22 = vector.load %arg2[%c2_24, %c0_25, %c0_26] : memref<3x64x128xbf16, #tpu.memory_space<vmem>>, vector<1x64x128xbf16>
    %23 = vector.shape_cast %22 : vector<1x64x128xbf16> to vector<64x128xbf16>
    %cst_27 = arith.constant dense<0.000000e+00> : vector<32x128xf32>
    %24 = tpu.matmul %21, %23, %cst_27 {dimension_numbers = #tpu.dot_dimension_numbers<[1], [0], [0], [1], [0, 0, 1, 1], [], []>} : vector<32x64xbf16>, vector<64x128xbf16>, vector<32x128xf32> -> vector<32x128xf32>
    %25 = arith.addf %18, %24 : vector<32x128xf32>
    %c0_28 = arith.constant 0 : index
    %c0_29 = arith.constant 0 : index
    %26 = vector.load %arg3[%c0_28, %c0_29] : memref<1x128xf32, #tpu.memory_space<vmem>>, vector<1x128xf32>
    %27 = vector.broadcast %26 : vector<1x128xf32> to vector<32x128xf32>
    %28 = arith.addf %25, %27 : vector<32x128xf32>
    %cst_30 = arith.constant 0.000000e+00 : f32
    %29 = vector.broadcast %cst_30 : f32 to vector<32x128xf32>
    %30 = arith.maximumf %28, %29 : vector<32x128xf32>
    %cst_31 = arith.constant 0.000000e+00 : f32
    %31 = vector.broadcast %cst_31 : f32 to vector<2x18x128xf32>
    %c0_32 = arith.constant 0 : index
    %c0_33 = arith.constant 0 : index
    %c0_34 = arith.constant 0 : index
    %32 = vector.load %arg8[%c0_32, %c0_33, %c0_34] : memref<2x18x128xf32, #tpu.memory_space<vmem>>, vector<2x18x128xf32>
    tpu.vector_store %arg8[%c0_32, %c0_33, %c0_34], %31 {strides = array<i32>} : memref<2x18x128xf32, #tpu.memory_space<vmem>>, vector<2x18x128xf32>,
    %33 = vector.shape_cast %30 : vector<32x128xf32> to vector<2x16x128xf32>
    %c0_35 = arith.constant 0 : index
    %c1_36 = arith.constant 1 : index
    %c0_37 = arith.constant 0 : index
    %34 = vector.load %arg8[%c0_35, %c1_36, %c0_37] : memref<2x18x128xf32, #tpu.memory_space<vmem>>, vector<2x16x128xf32>
    tpu.vector_store %arg8[%c0_35, %c1_36, %c0_37], %33 {strides = array<i32>} : memref<2x18x128xf32, #tpu.memory_space<vmem>>, vector<2x16x128xf32>,
    %cst_38 = arith.constant 0.000000e+00 : f32
    %35 = vector.broadcast %cst_38 : f32 to vector<32x64xf32>
    %c0_39 = arith.constant 0 : index
    %c0_40 = arith.constant 0 : index
    %c0_41 = arith.constant 0 : index
    %36 = vector.load %arg8[%c0_39, %c0_40, %c0_41] : memref<2x18x128xf32, #tpu.memory_space<vmem>>, vector<2x16x128xf32>
    %37 = vector.shape_cast %36 : vector<2x16x128xf32> to vector<32x128xf32>
    %38 = arith.truncf %37 : vector<32x128xf32> to vector<32x128xbf16>
    %c0_42 = arith.constant 0 : index
    %c0_43 = arith.constant 0 : index
    %c0_44 = arith.constant 0 : index
    %39 = vector.load %arg4[%c0_42, %c0_43, %c0_44] : memref<3x128x64xbf16, #tpu.memory_space<vmem>>, vector<1x128x64xbf16>
    %40 = vector.shape_cast %39 : vector<1x128x64xbf16> to vector<128x64xbf16>
    %cst_45 = arith.constant dense<0.000000e+00> : vector<32x64xf32>
    %41 = tpu.matmul %38, %40, %cst_45 {dimension_numbers = #tpu.dot_dimension_numbers<[1], [0], [0], [1], [0, 0, 1, 1], [], []>} : vector<32x128xbf16>, vector<128x64xbf16>, vector<32x64xf32> -> vector<32x64xf32>
    %42 = arith.addf %35, %41 : vector<32x64xf32>
    %c0_46 = arith.constant 0 : index
    %c1_47 = arith.constant 1 : index
    %c0_48 = arith.constant 0 : index
    %43 = vector.load %arg8[%c0_46, %c1_47, %c0_48] : memref<2x18x128xf32, #tpu.memory_space<vmem>>, vector<2x16x128xf32>
    %44 = vector.shape_cast %43 : vector<2x16x128xf32> to vector<32x128xf32>
    %45 = arith.truncf %44 : vector<32x128xf32> to vector<32x128xbf16>
    %c1_49 = arith.constant 1 : index
    %c0_50 = arith.constant 0 : index
    %c0_51 = arith.constant 0 : index
    %46 = vector.load %arg4[%c1_49, %c0_50, %c0_51] : memref<3x128x64xbf16, #tpu.memory_space<vmem>>, vector<1x128x64xbf16>
    %47 = vector.shape_cast %46 : vector<1x128x64xbf16> to vector<128x64xbf16>
    %cst_52 = arith.constant dense<0.000000e+00> : vector<32x64xf32>
    %48 = tpu.matmul %45, %47, %cst_52 {dimension_numbers = #tpu.dot_dimension_numbers<[1], [0], [0], [1], [0, 0, 1, 1], [], []>} : vector<32x128xbf16>, vector<128x64xbf16>, vector<32x64xf32> -> vector<32x64xf32>
    %49 = arith.addf %42, %48 : vector<32x64xf32>
    %c0_53 = arith.constant 0 : index
    %c2_54 = arith.constant 2 : index
    %c0_55 = arith.constant 0 : index
    %50 = vector.load %arg8[%c0_53, %c2_54, %c0_55] : memref<2x18x128xf32, #tpu.memory_space<vmem>>, vector<2x16x128xf32>
    %51 = vector.shape_cast %50 : vector<2x16x128xf32> to vector<32x128xf32>
    %52 = arith.truncf %51 : vector<32x128xf32> to vector<32x128xbf16>
    %c2_56 = arith.constant 2 : index
    %c0_57 = arith.constant 0 : index
    %c0_58 = arith.constant 0 : index
    %53 = vector.load %arg4[%c2_56, %c0_57, %c0_58] : memref<3x128x64xbf16, #tpu.memory_space<vmem>>, vector<1x128x64xbf16>
    %54 = vector.shape_cast %53 : vector<1x128x64xbf16> to vector<128x64xbf16>
    %cst_59 = arith.constant dense<0.000000e+00> : vector<32x64xf32>
    %55 = tpu.matmul %52, %54, %cst_59 {dimension_numbers = #tpu.dot_dimension_numbers<[1], [0], [0], [1], [0, 0, 1, 1], [], []>} : vector<32x128xbf16>, vector<128x64xbf16>, vector<32x64xf32> -> vector<32x64xf32>
    %56 = arith.addf %49, %55 : vector<32x64xf32>
    %c0_60 = arith.constant 0 : index
    %c0_61 = arith.constant 0 : index
    %57 = vector.load %arg5[%c0_60, %c0_61] : memref<1x64xf32, #tpu.memory_space<vmem>>, vector<1x64xf32>
    %58 = vector.broadcast %57 : vector<1x64xf32> to vector<32x64xf32>
    %59 = arith.addf %56, %58 : vector<32x64xf32>
    %c0_62 = arith.constant 0 : index
    %c0_63 = arith.constant 0 : index
    %60 = vector.load %arg6[%c0_62, %c0_63] : memref<32x64xf32, #tpu.memory_space<vmem>>, vector<32x64xf32>
    tpu.vector_store %arg6[%c0_62, %c0_63], %59 {strides = array<i32>} : memref<32x64xf32, #tpu.memory_space<vmem>>, vector<32x64xf32>,
    return
  }
  func.func @transform_0(%arg0: i32) -> (i32, i32, i32) {
    %c0_i32 = arith.constant 0 : i32
    %c0_i32_0 = arith.constant 0 : i32
    %c0_i32_1 = arith.constant 0 : i32
    %c0_i32_2 = arith.constant 0 : i32
    return %c0_i32, %c0_i32_0, %c0_i32_1 : i32, i32, i32
  }
  func.func @transform_1(%arg0: i32) -> (i32, i32, i32) {
    %c0_i32 = arith.constant 0 : i32
    %c0_i32_0 = arith.constant 0 : i32
    %c0_i32_1 = arith.constant 0 : i32
    %c0_i32_2 = arith.constant 0 : i32
    return %c0_i32, %c0_i32_0, %c0_i32_1 : i32, i32, i32
  }
  func.func @transform_2(%arg0: i32) -> (i32, i32) {
    %c0_i32 = arith.constant 0 : i32
    %c0_i32_0 = arith.constant 0 : i32
    %c0_i32_1 = arith.constant 0 : i32
    return %c0_i32, %c0_i32_0 : i32, i32
  }
  func.func @transform_3(%arg0: i32) -> (i32, i32, i32) {
    %c0_i32 = arith.constant 0 : i32
    %c0_i32_0 = arith.constant 0 : i32
    %c0_i32_1 = arith.constant 0 : i32
    %c0_i32_2 = arith.constant 0 : i32
    return %c0_i32, %c0_i32_0, %c0_i32_1 : i32, i32, i32
  }
  func.func @transform_4(%arg0: i32) -> (i32, i32) {
    %c0_i32 = arith.constant 0 : i32
    %c0_i32_0 = arith.constant 0 : i32
    %c0_i32_1 = arith.constant 0 : i32
    return %c0_i32, %c0_i32_0 : i32, i32
  }
  func.func @transform_5(%arg0: i32) -> (i32, i32) {
    %c0_i32 = arith.constant 0 : i32
    %c0_i32_0 = arith.constant 0 : i32
    %c0_i32_1 = arith.constant 0 : i32
    return %c0_i32, %c0_i32_0 : i32, i32
  }
}

</mosaic_0001>

<bundles_post_ra>
// kernel: tile.13
= control target key start
LH: loop header
LB: loop body
LE: loop exit
PB: predicated region body
PF: predicated region fallthrough
CT: control target
= control target key end

     0   :  { %s28_s0 = inlined_call_operand.vmem [shape: f32[8], index: 0, kind: input, shape index: {}]   ;;  %s29_s1 = inlined_call_operand.vmem [shape: f32[16,8], index: 1, kind: output, shape index: {}]  }
   0x1   :  { %v4_v0 = vld [vmem:[%s28_s0] ss:$0 sm:$0xff] }
   0x2   :  { %5 = vst [vmem:[%s29_s1] sm:$0xff] %v4_v0  ;;  %8 = vst [vmem:[%s29_s1 + $0x8] sm:$0xff] %v4_v0 }

// kernel: tile.14
= control target key start
LH: loop header
LB: loop body
LE: loop exit
PB: predicated region body
PF: predicated region fallthrough
CT: control target
= control target key end

     0   :  { %s133_s10 = smov 120   ;;  %s134_s11 = smov 104   ;;  %vm3_vm0 = vcmask 64512   ;;  %vm9_vm1 = vcmask 1048512   ;;  %vm15_vm2 = vcmask 982912   ;;  %vm21_vm3 = vcmask 917312   ;;  %s209_s0 = inlined_call_operand.vmem [shape: f32[16,8], index: 0, kind: input, shape index: {}]   ;;  %s210_s1 = inlined_call_operand.vmem [shape: f32[1,128], index: 1, kind: output, shape index: {}]  }
   0x1   :  { %v103_v0 = vld [vmem:[%s209_s0 + $0xf] sm:$0x1]   ;;  %v105_v1 = vld [vmem:[%s209_s0 + $0xd] sm:$0x1]   ;;  %v104_v2 = vld [vmem:[%s209_s0 + $0xe] sm:$0x1]  }
   0x2   :  { %7 = vrot.lane.b32.xlu0 %v103_v0, %s133_s10  ;;  %19 = vrot.lane.b32.xlu1 %v105_v1, %s134_s11  ;;  %v106_v3 = vld [vmem:[%s209_s0 + $0xc] sm:$0x1]   ;;  %s135_s16 = smov 112   ;;  %s136_s17 = smov 96   ;;  %v107_v4 = vld [vmem:[%s209_s0 + $0xb] sm:$0x1]  }
   0x3   :  { %v108_v5 = vld [vmem:[%s209_s0 + $0xa] sm:$0x1]   ;;  %v2_v6 = vld [vmem:[%s209_s0] sm:$0x1]   ;;  %s137_s24 = smov 88   ;;  %s138_s25 = smov 80  }
   0x4   :  { %4 = vst.msk [vmem:[#allocation0] sm:$0x1] %vm3_vm0, %v2_v6   ;;  %v109_v7 = vld [vmem:[%s209_s0 + $0x9] sm:$0x1]   ;;  %v110_v8 = vld [vmem:[%s209_s0 + $0x8] sm:$0x1]  }
   0x5   :  { %s139_s30 = smov 72   ;;  %s140_s2 = smov 64   ;;  %v111_v9 = vld [vmem:[%s209_s0 + $0x7] sm:$0x1]   ;;  %v112_v10 = vld [vmem:[%s209_s0 + $0x6] sm:$0x1]  }
   0x6   :  { %13 = vrot.lane.b32.xlu0 %v104_v2, %s135_s16  ;;  %25 = vrot.lane.b32.xlu1 %v106_v3, %s136_s17  ;;  %s141_s7 = smov 56   ;;  %s142_s8 = smov 48   ;;  %v113_v11 = vld [vmem:[%s209_s0 + $0x5] sm:$0x1]   ;;  %v114_v12 = vld [vmem:[%s209_s0 + $0x4] sm:$0x1]  }
   0x7   :  { %s143_s13 = smov 40   ;;  %s144_s14 = smov 32   ;;  %v115_v13 = vld [vmem:[%s209_s0 + $0x3] sm:$0x1]   ;;  %v116_v14 = vld [vmem:[%s209_s0 + $0x2] sm:$0x1]  }
   0x8   :  { %s145_s19 = smov 24   ;;  %s146_s20 = smov 16   ;;  %v117_v15 = vld [vmem:[%s209_s0 + $0x1] sm:$0x1]   ;;  %vm27_vm4 = vcmask 851712   ;;  %vm33_vm5 = vcmask 786112  }
   0x9   :  { %s147_s0 = smov 8   ;;  %vm39_vm6 = vcmask 720512   ;;  %vm45_vm7 = vcmask 654912   ;;  %vm51_vm8 = vcmask 589312   ;;  %vm57_vm9 = vcmask 523712  }
   0xa   :  { %31 = vrot.lane.b32.xlu0 %v107_v4, %s137_s24  ;;  %37 = vrot.lane.b32.xlu1 %v108_v5, %s138_s25  ;;  %vm63_vm10 = vcmask 458112   ;;  %vm69_vm11 = vcmask 392512   ;;  %vm75_vm12 = vcmask 326912   ;;  %vm81_vm13 = vcmask 261312  }
   0xb   :  { %vm87_vm14 = vcmask 195712   ;;  %vm93_vm15 = vcmask 130112  }
   0xe   :  { %43 = vrot.lane.b32.xlu0 %v109_v7, %s139_s30  ;;  %49 = vrot.lane.b32.xlu1 %v110_v8, %s140_s2 }
  0x12   :  { %55 = vrot.lane.b32.xlu0 %v111_v9, %s141_s7  ;;  %61 = vrot.lane.b32.xlu1 %v112_v10, %s142_s8 }
  0x16   :  { %67 = vrot.lane.b32.xlu0 %v113_v11, %s143_s13  ;;  %73 = vrot.lane.b32.xlu1 %v114_v12, %s144_s14 }
  0x1a   :  { %79 = vrot.lane.b32.xlu0 %v115_v13, %s145_s19  ;;  %85 = vrot.lane.b32.xlu1 %v116_v14, %s146_s20 }
  0x1e   :  { %91 = vrot.lane.b32.xlu0 %v117_v15, %s147_s0 }
  0x74   :  { %v8_v16 = vpop.permute.xlu0 %7   ;;  %v20_v17 = vpop.permute.xlu1 %19  }
  0x75   :  { %10 = vst.msk [vmem:[#allocation0] sm:$0x1] %vm9_vm1, %v8_v16  }
  0x78   :  { %v14_v18 = vpop.permute.xlu0 %13   ;;  %v26_v19 = vpop.permute.xlu1 %25  }
  0x79   :  { %16 = vst.msk [vmem:[#allocation0] sm:$0x1] %vm15_vm2, %v14_v18  }
  0x7a   :  { %22 = vst.msk [vmem:[#allocation0] sm:$0x1] %vm21_vm3, %v20_v17  }
  0x7b   :  { %28 = vst.msk [vmem:[#allocation0] sm:$0x1] %vm27_vm4, %v26_v19  }
  0x7c   :  { %v32_v20 = vpop.permute.xlu0 %31   ;;  %v38_v21 = vpop.permute.xlu1 %37  }
  0x7d   :  { %34 = vst.msk [vmem:[#allocation0] sm:$0x1] %vm33_vm5, %v32_v20  }
  0x7e   :  { %40 = vst.msk [vmem:[#allocation0] sm:$0x1] %vm39_vm6, %v38_v21  }
  0x80   :  { %v44_v22 = vpop.permute.xlu0 %43   ;;  %v50_v23 = vpop.permute.xlu1 %49  }
  0x81   :  { %46 = vst.msk [vmem:[#allocation0] sm:$0x1] %vm45_vm7, %v44_v22  }
  0x82   :  { %52 = vst.msk [vmem:[#allocation0] sm:$0x1] %vm51_vm8, %v50_v23  }
  0x84   :  { %v56_v24 = vpop.permute.xlu0 %55   ;;  %v62_v25 = vpop.permute.xlu1 %61  }
  0x85   :  { %58 = vst.msk [vmem:[#allocation0] sm:$0x1] %vm57_vm9, %v56_v24  }
  0x86   :  { %64 = vst.msk [vmem:[#allocation0] sm:$0x1] %vm63_vm10, %v62_v25  }
  0x88   :  { %v68_v26 = vpop.permute.xlu0 %67   ;;  %v74_v27 = vpop.permute.xlu1 %73  }
  0x89   :  { %70 = vst.msk [vmem:[#allocation0] sm:$0x1] %vm69_vm11, %v68_v26  }
  0x8a   :  { %76 = vst.msk [vmem:[#allocation0] sm:$0x1] %vm75_vm12, %v74_v27  }
  0x8c   :  { %v80_v28 = vpop.permute.xlu0 %79   ;;  %v86_v29 = vpop.permute.xlu1 %85  }
  0x8d   :  { %82 = vst.msk [vmem:[#allocation0] sm:$0x1] %vm81_vm13, %v80_v28  }
  0x8e   :  { %88 = vst.msk [vmem:[#allocation0] sm:$0x1] %vm87_vm14, %v86_v29  }
  0x90   :  { %v92_v30 = vpop.permute.xlu0 %91  }
  0x91   :  { %94 = vst.msk [vmem:[#allocation0] sm:$0x1] %vm93_vm15, %v92_v30  }
  0x98   :  { %v99_v31 = vld [vmem:[#allocation0] sm:$0x1] }
  0x99   :  { %102 = vst [vmem:[%s210_s1] sm:$0x1] %v99_v31 }

// kernel: tile.18
= control target key start
LH: loop header
LB: loop body
LE: loop exit
PB: predicated region body
PF: predicated region fallthrough
CT: control target
= control target key end

     0   :  { %s28_s0 = inlined_call_operand.vmem [shape: f32[4], index: 0, kind: input, shape index: {}]   ;;  %s29_s1 = inlined_call_operand.vmem [shape: f32[16,4], index: 1, kind: output, shape index: {}]  }
   0x1   :  { %v4_v0 = vld [vmem:[%s28_s0] ss:$0 sm:$0xff] }
   0x2   :  { %5 = vst [vmem:[%s29_s1] sm:$0xff] %v4_v0  ;;  %8 = vst [vmem:[%s29_s1 + $0x8] sm:$0xff] %v4_v0 }

// kernel: tile.19
= control target key start
LH: loop header
LB: loop body
LE: loop exit
PB: predicated region body
PF: predicated region fallthrough
CT: control target
= control target key end

     0   :  { %s133_s10 = smov 60   ;;  %s134_s11 = smov 52   ;;  %vm3_vm0 = vcmask 31744   ;;  %vm9_vm1 = vcmask 523744   ;;  %vm15_vm2 = vcmask 490944   ;;  %vm21_vm3 = vcmask 458144   ;;  %s209_s0 = inlined_call_operand.vmem [shape: f32[16,4], index: 0, kind: input, shape index: {}]   ;;  %s210_s1 = inlined_call_operand.vmem [shape: f32[1,64], index: 1, kind: output, shape index: {}]  }
   0x1   :  { %v103_v0 = vld [vmem:[%s209_s0 + $0xf] sm:$0x1]   ;;  %v105_v1 = vld [vmem:[%s209_s0 + $0xd] sm:$0x1]   ;;  %v104_v2 = vld [vmem:[%s209_s0 + $0xe] sm:$0x1]  }
   0x2   :  { %7 = vrot.lane.b32.xlu0 %v103_v0, %s133_s10  ;;  %19 = vrot.lane.b32.xlu1 %v105_v1, %s134_s11  ;;  %v106_v3 = vld [vmem:[%s209_s0 + $0xc] sm:$0x1]   ;;  %s135_s16 = smov 56   ;;  %s136_s17 = smov 48   ;;  %v107_v4 = vld [vmem:[%s209_s0 + $0xb] sm:$0x1]  }
   0x3   :  { %v108_v5 = vld [vmem:[%s209_s0 + $0xa] sm:$0x1]   ;;  %v2_v6 = vld [vmem:[%s209_s0] sm:$0x1]   ;;  %s137_s24 = smov 44   ;;  %s138_s25 = smov 40  }
   0x4   :  { %4 = vst.msk [vmem:[#allocation0] sm:$0x1] %vm3_vm0, %v2_v6   ;;  %v109_v7 = vld [vmem:[%s209_s0 + $0x9] sm:$0x1]   ;;  %v110_v8 = vld [vmem:[%s209_s0 + $0x8] sm:$0x1]  }
   0x5   :  { %s139_s30 = smov 36   ;;  %s140_s2 = smov 32   ;;  %v111_v9 = vld [vmem:[%s209_s0 + $0x7] sm:$0x1]   ;;  %v112_v10 = vld [vmem:[%s209_s0 + $0x6] sm:$0x1]  }
   0x6   :  { %13 = vrot.lane.b32.xlu0 %v104_v2, %s135_s16  ;;  %25 = vrot.lane.b32.xlu1 %v106_v3, %s136_s17  ;;  %s141_s7 = smov 28   ;;  %s142_s8 = smov 24   ;;  %v113_v11 = vld [vmem:[%s209_s0 + $0x5] sm:$0x1]   ;;  %v114_v12 = vld [vmem:[%s209_s0 + $0x4] sm:$0x1]  }
   0x7   :  { %s143_s13 = smov 20   ;;  %s144_s14 = smov 16   ;;  %v115_v13 = vld [vmem:[%s209_s0 + $0x3] sm:$0x1]   ;;  %v116_v14 = vld [vmem:[%s209_s0 + $0x2] sm:$0x1]  }
   0x8   :  { %s145_s19 = smov 12   ;;  %s146_s20 = smov 8   ;;  %v117_v15 = vld [vmem:[%s209_s0 + $0x1] sm:$0x1]   ;;  %vm27_vm4 = vcmask 425344   ;;  %vm33_vm5 = vcmask 392544  }
   0x9   :  { %s147_s0 = smov 4   ;;  %vm39_vm6 = vcmask 359744   ;;  %vm45_vm7 = vcmask 326944   ;;  %vm51_vm8 = vcmask 294144   ;;  %vm57_vm9 = vcmask 261344  }
   0xa   :  { %31 = vrot.lane.b32.xlu0 %v107_v4, %s137_s24  ;;  %37 = vrot.lane.b32.xlu1 %v108_v5, %s138_s25  ;;  %vm63_vm10 = vcmask 228544   ;;  %vm69_vm11 = vcmask 195744   ;;  %vm75_vm12 = vcmask 162944   ;;  %vm81_vm13 = vcmask 130144  }
   0xb   :  { %vm87_vm14 = vcmask 97344   ;;  %vm93_vm15 = vcmask 64544  }
   0xe   :  { %43 = vrot.lane.b32.xlu0 %v109_v7, %s139_s30  ;;  %49 = vrot.lane.b32.xlu1 %v110_v8, %s140_s2 }
  0x12   :  { %55 = vrot.lane.b32.xlu0 %v111_v9, %s141_s7  ;;  %61 = vrot.lane.b32.xlu1 %v112_v10, %s142_s8 }
  0x16   :  { %67 = vrot.lane.b32.xlu0 %v113_v11, %s143_s13  ;;  %73 = vrot.lane.b32.xlu1 %v114_v12, %s144_s14 }
  0x1a   :  { %79 = vrot.lane.b32.xlu0 %v115_v13, %s145_s19  ;;  %85 = vrot.lane.b32.xlu1 %v116_v14, %s146_s20 }
  0x1e   :  { %91 = vrot.lane.b32.xlu0 %v117_v15, %s147_s0 }
  0x74   :  { %v8_v16 = vpop.permute.xlu0 %7   ;;  %v20_v17 = vpop.permute.xlu1 %19  }
  0x75   :  { %10 = vst.msk [vmem:[#allocation0] sm:$0x1] %vm9_vm1, %v8_v16  }
  0x78   :  { %v14_v18 = vpop.permute.xlu0 %13   ;;  %v26_v19 = vpop.permute.xlu1 %25  }
  0x79   :  { %16 = vst.msk [vmem:[#allocation0] sm:$0x1] %vm15_vm2, %v14_v18  }
  0x7a   :  { %22 = vst.msk [vmem:[#allocation0] sm:$0x1] %vm21_vm3, %v20_v17  }
  0x7b   :  { %28 = vst.msk [vmem:[#allocation0] sm:$0x1] %vm27_vm4, %v26_v19  }
  0x7c   :  { %v32_v20 = vpop.permute.xlu0 %31   ;;  %v38_v21 = vpop.permute.xlu1 %37  }
  0x7d   :  { %34 = vst.msk [vmem:[#allocation0] sm:$0x1] %vm33_vm5, %v32_v20  }
  0x7e   :  { %40 = vst.msk [vmem:[#allocation0] sm:$0x1] %vm39_vm6, %v38_v21  }
  0x80   :  { %v44_v22 = vpop.permute.xlu0 %43   ;;  %v50_v23 = vpop.permute.xlu1 %49  }
  0x81   :  { %46 = vst.msk [vmem:[#allocation0] sm:$0x1] %vm45_vm7, %v44_v22  }
  0x82   :  { %52 = vst.msk [vmem:[#allocation0] sm:$0x1] %vm51_vm8, %v50_v23  }
  0x84   :  { %v56_v24 = vpop.permute.xlu0 %55   ;;  %v62_v25 = vpop.permute.xlu1 %61  }
  0x85   :  { %58 = vst.msk [vmem:[#allocation0] sm:$0x1] %vm57_vm9, %v56_v24  }
  0x86   :  { %64 = vst.msk [vmem:[#allocation0] sm:$0x1] %vm63_vm10, %v62_v25  }
  0x88   :  { %v68_v26 = vpop.permute.xlu0 %67   ;;  %v74_v27 = vpop.permute.xlu1 %73  }
  0x89   :  { %70 = vst.msk [vmem:[#allocation0] sm:$0x1] %vm69_vm11, %v68_v26  }
  0x8a   :  { %76 = vst.msk [vmem:[#allocation0] sm:$0x1] %vm75_vm12, %v74_v27  }
  0x8c   :  { %v80_v28 = vpop.permute.xlu0 %79   ;;  %v86_v29 = vpop.permute.xlu1 %85  }
  0x8d   :  { %82 = vst.msk [vmem:[#allocation0] sm:$0x1] %vm81_vm13, %v80_v28  }
  0x8e   :  { %88 = vst.msk [vmem:[#allocation0] sm:$0x1] %vm87_vm14, %v86_v29  }
  0x90   :  { %v92_v30 = vpop.permute.xlu0 %91  }
  0x91   :  { %94 = vst.msk [vmem:[#allocation0] sm:$0x1] %vm93_vm15, %v92_v30  }
  0x98   :  { %v99_v31 = vld [vmem:[#allocation0] sm:$0x1] }
  0x99   :  { %102 = vst [vmem:[%s210_s1] sm:$0x1] %v99_v31 }

// kernel: abstract_net_forward.1
= control target key start
LH: loop header
LB: loop body
LE: loop exit
PB: predicated region body
PF: predicated region fallthrough
CT: control target
= control target key end

     0   :  { %vm21_vm0 = vcmask 523264   ;;  %vm24_vm1 = vcmask 517120   ;;  %v1002_v1 = vmov 0.0   ;;  %s1189_s1 = inlined_call_operand.vmem [shape: bf16[3,64,128], index: 1, kind: input, shape index: {}]   ;;  %s1190_s0 = inlined_call_operand.vmem [shape: f32[2,16,64], index: 0, kind: input, shape index: {}]   ;;  %s1191_s3 = inlined_call_operand.vmem [shape: bf16[3,128,64], index: 3, kind: input, shape index: {}]   ;;  %s1192_s2 = inlined_call_operand.vmem [shape: f32[1,128], index: 2, kind: input, shape index: {}]   ;;  %s1193_s4 = inlined_call_operand.vmem [shape: f32[1,64], index: 4, kind: input, shape index: {}]   ;;  %s1194_s5 = inlined_call_operand.vmem [shape: f32[32,64], index: 5, kind: output, shape index: {}]  }
   0x1   :  { %v966_v0 = vld [vmem:[%s1189_s1 + $0x38] sm:$0xff]   ;;  %22 = vst.msk [vmem:[#allocation2] sm:$0xff] %vm21_vm0, %v1002_v1  ;;  %23 = vst.msk [vmem:[#allocation2 + $0x8] sm:$0xff] %vm21_vm0, %v1002_v1  ;;  %v968_v3 = vld [vmem:[%s1189_s1 + $0x30] sm:$0xff]  }
   0x2   :  { %25 = vst.msk [vmem:[#allocation2 + $0x10] sm:$0x3] %vm24_vm1, %v1002_v1  ;;  %28 = vst.msk [vmem:[#allocation2 + $0x28] sm:$0x3] %vm24_vm1, %v1002_v1  ;;  %v967_v2 = vld [vmem:[%s1189_s1 + $0x18] sm:$0xff]   ;;  %869 = vmatprep.subr.bf16.mxu0 %v966_v0  ;;  %v969_v4 = vld [vmem:[%s1189_s1 + $0x10] sm:$0xff]  }
   0x3   :  { %26 = vst.msk [vmem:[#allocation2 + $0x18] sm:$0xff] %vm21_vm0, %v1002_v1  ;;  %27 = vst.msk [vmem:[#allocation2 + $0x20] sm:$0xff] %vm21_vm0, %v1002_v1  ;;  %881 = vmatprep.subr.bf16.mxu1 %v967_v2  ;;  %870 = vmatpush3.bf16.msra.mxu0 %v966_v0  ;;  %v970_v5 = vld [vmem:[%s1189_s1 + $0x28] sm:$0xff]   ;;  %v972_v7 = vld [vmem:[%s1189_s1 + $0x20] sm:$0xff]  }
   0x4   :  { %337 = vst [vmem:[#allocation3] sm:$0xff] %v1002_v1  ;;  %338 = vst [vmem:[#allocation3 + $0x8] sm:$0xff] %v1002_v1  ;;  %882 = vmatpush3.bf16.msra.mxu1 %v967_v2  ;;  %871 = vmatprep.subr.bf16.mxu0 %v968_v3  ;;  %v971_v6 = vld [vmem:[%s1189_s1 + $0x8] sm:$0xff]   ;;  %v973_v8 = vld [vmem:[%s1189_s1] sm:$0xff]  }
   0x5   :  { %339 = vst [vmem:[#allocation3 + $0x10] sm:$0x3] %v1002_v1  ;;  %340 = vst [vmem:[#allocation3 + $0x18] sm:$0xff] %v1002_v1  ;;  %883 = vmatprep.subr.bf16.mxu1 %v969_v4  ;;  %v29_v9 = vld [vmem:[%s1190_s0] sm:$0xff]  ;;  %v30_v10 = vld [vmem:[%s1190_s0 + $0x8] sm:$0xff] }
   0x6   :  { %341 = vst [vmem:[#allocation3 + $0x20] sm:$0xff] %v1002_v1  ;;  %342 = vst [vmem:[#allocation3 + $0x28] sm:$0x3] %v1002_v1  ;;  %v31_v11 = vld [vmem:[%s1190_s0 + $0x10] sm:$0xff]  ;;  %v32_v12 = vld [vmem:[%s1190_s0 + $0x18] sm:$0xff] }
   0x7   :  { %872 = vmatpush3.bf16.msra.mxu0 %v968_v3  ;;  %33 = vst.msk [vmem:[#allocation2 + $0x1] sm:$0xff] %vm21_vm0, %v29_v9  ;;  %34 = vst.msk [vmem:[#allocation2 + $0x9] sm:$0xff] %vm21_vm0, %v30_v10  ;;  %v974_v13 = vld [vmem:[%s1189_s1 + $0x58] sm:$0xff]   ;;  %v975_v17 = vld [vmem:[%s1189_s1 + $0x50] sm:$0xff]  }
   0x8   :  { %884 = vmatpush3.bf16.msra.mxu1 %v969_v4  ;;  %873 = vmatprep.subr.bf16.mxu0 %v970_v5  ;;  %35 = vst.msk [vmem:[#allocation2 + $0x19] sm:$0xff] %vm21_vm0, %v31_v11  ;;  %36 = vst.msk [vmem:[#allocation2 + $0x21] sm:$0xff] %vm21_vm0, %v32_v12  ;;  %v976_v30 = vld [vmem:[%s1189_s1 + $0x48] sm:$0xff]   ;;  %v977_v31 = vld [vmem:[%s1189_s1 + $0x40] sm:$0xff]  }
   0x9   :  { %885 = vmatprep.subr.bf16.mxu1 %v971_v6  ;;  %v978_v35 = vld [vmem:[%s1191_s3 + $0x78] sm:$0xff]   ;;  %v980_v36 = vld [vmem:[%s1191_s3 + $0x70] sm:$0xff]   ;;  %v982_v37 = vld [vmem:[%s1191_s3 + $0x68] sm:$0xff]  }
   0xa   :  { %v979_v38 = vld [vmem:[%s1191_s3 + $0x38] sm:$0xff]   ;;  %v981_v39 = vld [vmem:[%s1191_s3 + $0x30] sm:$0xff]   ;;  %v984_v40 = vld [vmem:[%s1191_s3 + $0x60] sm:$0xff]  }
   0xb   :  { %874 = vmatpush3.bf16.msra.mxu0 %v970_v5  ;;  %v986_v41 = vld [vmem:[%s1191_s3 + $0x58] sm:$0xff]   ;;  %v983_v42 = vld [vmem:[%s1191_s3 + $0x28] sm:$0xff]   ;;  %v988_v43 = vld [vmem:[%s1191_s3 + $0x50] sm:$0xff]  }
   0xc   :  { %886 = vmatpush3.bf16.msra.mxu1 %v971_v6  ;;  %875 = vmatprep.subr.bf16.mxu0 %v972_v7  ;;  %v985_v44 = vld [vmem:[%s1191_s3 + $0x20] sm:$0xff]   ;;  %v990_v45 = vld [vmem:[%s1191_s3 + $0x48] sm:$0xff]   ;;  %v987_v46 = vld [vmem:[%s1191_s3 + $0x18] sm:$0xff]  }
   0xd   :  { %887 = vmatprep.subr.bf16.mxu1 %v973_v8  ;;  %v992_v47 = vld [vmem:[%s1191_s3 + $0x40] sm:$0xff]   ;;  %v989_v48 = vld [vmem:[%s1191_s3 + $0x10] sm:$0xff]   ;;  %v991_v49 = vld [vmem:[%s1191_s3 + $0x8] sm:$0xff]  }
   0xe   :  { %v51_v14 = vld [vmem:[#allocation2 + $0x1] sm:$0xff]  ;;  %v52_v15 = vld [vmem:[#allocation2 + $0x9] sm:$0xff]  ;;  %v994_v50 = vld [vmem:[%s1191_s3 + $0xb8] sm:$0xff]  }
   0xf   :  { %876 = vmatpush3.bf16.msra.mxu0 %v972_v7  ;;  %v37_v16 = vld [vmem:[#allocation2] sm:$0xff]  ;;  %v55_v18 = vpack.c.bf16 %v52_v15, %v51_v14  ;;  %v38_v19 = vld [vmem:[#allocation2 + $0x8] sm:$0xff]  ;;  %v39_v24 = vld [vmem:[#allocation2 + $0x18] sm:$0xff] }
  0x10   :  { %888 = vmatpush3.bf16.msra.mxu1 %v973_v8  ;;  %893 = vmatprep.subr.bf16.mxu0 %v974_v13  ;;  %v53_v20 = vld [vmem:[#allocation2 + $0x19] sm:$0xff]  ;;  %v54_v21 = vld [vmem:[#allocation2 + $0x21] sm:$0xff]  ;;  %v41_v22 = vpack.c.bf16 %v38_v19, %v37_v16  ;;  %v225_v28 = vld [vmem:[#allocation2 + $0xa] sm:$0xff] }
  0x11   :  { %v56_v23 = vpack.c.bf16 %v54_v21, %v53_v20  ;;  %v40_v25 = vld [vmem:[#allocation2 + $0x20] sm:$0xff]  ;;  %877 = vmatprep.mubr.msk.bf16.mxu0 %vm21_vm0, %v55_v18  ;;  %905 = vmatprep.subr.bf16.mxu1 %v978_v35  ;;  %v995_v19 = vld [vmem:[%s1191_s3 + $0xb0] sm:$0xff]   ;;  %v996_v20 = vld [vmem:[%s1191_s3 + $0xa8] sm:$0xff]  }
  0x12   :  { %v224_v26 = vld [vmem:[#allocation2 + $0x2] sm:$0xff]  ;;  %v42_v27 = vpack.c.bf16 %v40_v25, %v39_v24  ;;  %889 = vmatprep.mubr.msk.bf16.mxu1 %vm21_vm0, %v41_v22  ;;  %v226_v32 = vld [vmem:[#allocation2 + $0x1a] sm:$0xff] }
  0x13   :  { %878 = vmatmul.mubr.msk.bf16.vlgmr.msra.gmra.mxu0 %vm21_vm0, %v56_v23  ;;  %v228_v29 = vpack.c.bf16 %v225_v28, %v224_v26  ;;  %v227_v33 = vld [vmem:[#allocation2 + $0x22] sm:$0xff]  ;;  %v763_v61 = vld [vmem:[%s1192_s2] ss:$0 sm:$0xff] }
  0x14   :  { %890 = vmatmul.mubr.msk.bf16.vlgmr.msra.gmra.mxu1 %vm21_vm0, %v42_v27  ;;  %894 = vmatpush3.bf16.msra.mxu0 %v974_v13  ;;  %v229_v34 = vpack.c.bf16 %v227_v33, %v226_v32  ;;  %v993_v51 = vld [vmem:[%s1191_s3] sm:$0xff]   ;;  %v999_v32 = vld [vmem:[%s1191_s3 + $0x90] sm:$0xff]   ;;  %v1000_v33 = vld [vmem:[%s1191_s3 + $0x88] sm:$0xff]  }
  0x15   :  { %895 = vmatprep.subr.bf16.mxu0 %v975_v17  ;;  %901 = vmatprep.mubr.msk.bf16.mxu0 %vm21_vm0, %v228_v29 }
  0x16   :  { %906 = vmatpush3.bf16.msra.mxu1 %v978_v35 }
  0x17   :  { %907 = vmatprep.subr.bf16.mxu1 %v980_v36 }
  0x18   :  { %896 = vmatpush3.bf16.msra.mxu0 %v975_v17 }
  0x19   :  { %897 = vmatprep.subr.bf16.mxu0 %v976_v30 }
  0x1a   :  { %908 = vmatpush3.bf16.msra.mxu1 %v980_v36 }
  0x1b   :  { %909 = vmatprep.subr.bf16.mxu1 %v982_v37 }
  0x1c   :  { %898 = vmatpush3.bf16.msra.mxu0 %v976_v30  ;;  %v997_v30 = vld [vmem:[%s1191_s3 + $0xa0] sm:$0xff]  }
  0x1d   :  { %899 = vmatprep.subr.bf16.mxu0 %v977_v31 }
  0x1e   :  { %910 = vmatpush3.bf16.msra.mxu1 %v982_v37 }
  0x1f   :  { %911 = vmatprep.subr.bf16.mxu1 %v984_v40 }
  0x20   :  { %900 = vmatpush3.bf16.msra.mxu0 %v977_v31  ;;  %v998_v31 = vld [vmem:[%s1191_s3 + $0x98] sm:$0xff]  }
  0x21   :  { %925 = vmatprep.subr.bf16.mxu0 %v979_v38 }
  0x22   :  { %912 = vmatpush3.bf16.msra.mxu1 %v984_v40 }
  0x23   :  { %902 = vmatmul.mubr.msk.bf16.vlgmr.msra.gmra.mxu0 %vm21_vm0, %v229_v34  ;;  %913 = vmatprep.subr.bf16.mxu1 %v986_v41  ;;  %v1001_v34 = vld [vmem:[%s1191_s3 + $0x80] sm:$0xff]  }
  0x24   :  { %926 = vmatpush3.bf16.msra.mxu0 %v979_v38 }
  0x25   :  { %927 = vmatprep.subr.bf16.mxu0 %v981_v39 }
  0x26   :  { %914 = vmatpush3.bf16.msra.mxu1 %v986_v41 }
  0x27   :  { %915 = vmatprep.subr.bf16.mxu1 %v988_v43 }
  0x28   :  { %928 = vmatpush3.bf16.msra.mxu0 %v981_v39 }
  0x29   :  { %929 = vmatprep.subr.bf16.mxu0 %v983_v42 }
  0x2a   :  { %916 = vmatpush3.bf16.msra.mxu1 %v988_v43 }
  0x2b   :  { %917 = vmatprep.subr.bf16.mxu1 %v990_v45 }
  0x2c   :  { %930 = vmatpush3.bf16.msra.mxu0 %v983_v42 }
  0x2d   :  { %931 = vmatprep.subr.bf16.mxu0 %v985_v44 }
  0x2e   :  { %918 = vmatpush3.bf16.msra.mxu1 %v990_v45 }
  0x2f   :  { %919 = vmatprep.subr.bf16.mxu1 %v992_v47 }
  0x30   :  { %932 = vmatpush3.bf16.msra.mxu0 %v985_v44 }
  0x31   :  { %933 = vmatprep.subr.bf16.mxu0 %v987_v46 }
  0x32   :  { %920 = vmatpush3.bf16.msra.mxu1 %v992_v47  ;;  %v820_v47 = vld [vmem:[%s1193_s4] ss:$0 sm:$0xff] }
  0x33   :  { %945 = vmatprep.subr.bf16.mxu1 %v994_v50 }
  0x34   :  { %934 = vmatpush3.bf16.msra.mxu0 %v987_v46 }
  0x35   :  { %935 = vmatprep.subr.bf16.mxu0 %v989_v48 }
  0x38   :  { %936 = vmatpush3.bf16.msra.mxu0 %v989_v48 }
  0x39   :  { %937 = vmatprep.subr.bf16.mxu0 %v991_v49 }
  0x3c   :  { %938 = vmatpush3.bf16.msra.mxu0 %v991_v49 }
  0x3d   :  { %939 = vmatprep.subr.bf16.mxu0 %v993_v51 }
  0x40   :  { %940 = vmatpush3.bf16.msra.mxu0 %v993_v51 }
  0xd3   :  { %v879_v52 = vpop.f32.mrf.mxu0 }
  0xd4   :  { %v891_v53 = vpop.f32.mrf.mxu1 }
  0xd5   :  { %v130_v54 = vpop.f32.mrf.mxu0  ;;  %v218_v59 = vadd.f32 %v891_v53, %v879_v52 }
  0xd6   :  { %v209_v55 = vpop.f32.mrf.mxu1 }
  0xd7   :  { %v880_v56 = vpop.f32.mrf.mxu0  ;;  %v210_v62 = vadd.f32 %v209_v55, %v130_v54 }
  0xd8   :  { %v892_v57 = vpop.f32.mrf.mxu1 }
  0xd9   :  { %v133_v58 = vpop.f32.mrf.mxu0  ;;  %v221_v2 = vadd.f32 %v892_v57, %v880_v56 }
  0xda   :  { %v212_v0 = vpop.f32.mrf.mxu1 }
  0xdb   :  { %v213_v6 = vadd.f32 %v212_v0, %v133_v58 }
  0xe3   :  { %v903_v60 = vpop.f32.mrf.mxu0 }
  0xe4   :  { %v320_v63 = vadd.f32 %v903_v60, %v218_v59 }
  0xe5   :  { %v303_v1 = vpop.f32.mrf.mxu0 }
  0xe6   :  { %v331_v3 = vadd.f32 %v763_v61, %v320_v63  ;;  %v318_v4 = vadd.f32 %v303_v1, %v210_v62 }
  0xe7   :  { %v904_v5 = vpop.f32.mrf.mxu0 }
  0xe8   :  { %v335_v7 = vmax.f32 %v331_v3, 0.0  ;;  %v329_v8 = vadd.f32 %v763_v61, %v318_v4  ;;  %v321_v9 = vadd.f32 %v904_v5, %v221_v2 }
  0xe9   :  { %v306_v10 = vpop.f32.mrf.mxu0 }
  0xea   :  { %345 = vst [vmem:[#allocation3 + $0x19] sm:$0xff] %v335_v7  ;;  %v333_v11 = vmax.f32 %v329_v8, 0.0  ;;  %v332_v12 = vadd.f32 %v763_v61, %v321_v9  ;;  %v319_v13 = vadd.f32 %v306_v10, %v213_v6 }
  0xec   :  { %343 = vst [vmem:[#allocation3 + $0x1] sm:$0xff] %v333_v11  ;;  %v336_v14 = vmax.f32 %v332_v12, 0.0  ;;  %v330_v15 = vadd.f32 %v763_v61, %v319_v13 }
  0xee   :  { %346 = vst [vmem:[#allocation3 + $0x21] sm:$0xff] %v336_v14  ;;  %v334_v16 = vmax.f32 %v330_v15, 0.0  ;;  %v374_v18 = vpack.c.bf16 %v336_v14, %v335_v7 }
  0xf0   :  { %344 = vst [vmem:[#allocation3 + $0x9] sm:$0xff] %v334_v16  ;;  %v373_v17 = vpack.c.bf16 %v334_v16, %v333_v11 }
  0xf1   :  { %v349_v27 = vld [vmem:[#allocation3 + $0x18] sm:$0xff] }
  0xf2   :  { %921 = vmatprep.mubr.bf16.mxu1 %v373_v17 }
  0xf3   :  { %922 = vmatmul.mubr.bf16.vlgmr.msra.gmra.mxu1 %v374_v18  ;;  %v347_v21 = vld [vmem:[#allocation3] sm:$0xff] }
  0xf4   :  { %946 = vmatpush3.bf16.msra.mxu1 %v994_v50 }
  0xf5   :  { %947 = vmatprep.subr.bf16.mxu1 %v995_v19  ;;  %v350_v22 = vld [vmem:[#allocation3 + $0x20] sm:$0xff] }
  0xf6   :  { %v352_v29 = vpack.c.bf16 %v350_v22, %v349_v27  ;;  %v588_v35 = vld [vmem:[#allocation3 + $0x1a] sm:$0xff]  ;;  %v589_v36 = vld [vmem:[#allocation3 + $0x22] sm:$0xff] }
  0xf7   :  { %v348_v23 = vld [vmem:[#allocation3 + $0x8] sm:$0xff]  ;;  %v591_v37 = vpack.c.bf16 %v589_v36, %v588_v35 }
  0xf8   :  { %v586_v24 = vld [vmem:[#allocation3 + $0x2] sm:$0xff]  ;;  %v587_v25 = vld [vmem:[#allocation3 + $0xa] sm:$0xff]  ;;  %v351_v26 = vpack.c.bf16 %v348_v23, %v347_v21  ;;  %948 = vmatpush3.bf16.msra.mxu1 %v995_v19 }
  0xf9   :  { %v590_v28 = vpack.c.bf16 %v587_v25, %v586_v24  ;;  %949 = vmatprep.subr.bf16.mxu1 %v996_v20 }
  0xfa   :  { %941 = vmatprep.mubr.bf16.mxu0 %v351_v26 }
  0xfb   :  { %961 = vmatprep.mubr.bf16.mxu1 %v590_v28  ;;  %942 = vmatmul.mubr.bf16.vlgmr.msra.gmra.mxu0 %v352_v29 }
  0xfc   :  { %950 = vmatpush3.bf16.msra.mxu1 %v996_v20 }
  0xfd   :  { %951 = vmatprep.subr.bf16.mxu1 %v997_v30 }
 0x100   :  { %952 = vmatpush3.bf16.msra.mxu1 %v997_v30 }
 0x101   :  { %953 = vmatprep.subr.bf16.mxu1 %v998_v31 }
 0x104   :  { %954 = vmatpush3.bf16.msra.mxu1 %v998_v31 }
 0x105   :  { %955 = vmatprep.subr.bf16.mxu1 %v999_v32 }
 0x108   :  { %956 = vmatpush3.bf16.msra.mxu1 %v999_v32 }
 0x109   :  { %957 = vmatprep.subr.bf16.mxu1 %v1000_v33 }
 0x10c   :  { %958 = vmatpush3.bf16.msra.mxu1 %v1000_v33 }
 0x10d   :  { %959 = vmatprep.subr.bf16.mxu1 %v1001_v34 }
 0x110   :  { %960 = vmatpush3.bf16.msra.mxu1 %v1001_v34 }
 0x113   :  { %962 = vmatmul.mubr.bf16.vlgmr.msra.gmra.mxu1 %v591_v37 }
 0x1b3   :  { %v923_v38 = vpop.f32.mrf.mxu1 }
 0x1b5   :  { %v474_v40 = vpop.f32.mrf.mxu1 }
 0x1b7   :  { %v924_v42 = vpop.f32.mrf.mxu1 }
 0x1b9   :  { %v477_v44 = vpop.f32.mrf.mxu1 }
 0x1bb   :  { %v943_v39 = vpop.f32.mrf.mxu0 }
 0x1bc   :  { %v580_v45 = vadd.f32 %v943_v39, %v923_v38 }
 0x1bd   :  { %v571_v41 = vpop.f32.mrf.mxu0 }
 0x1be   :  { %v572_v48 = vadd.f32 %v571_v41, %v474_v40 }
 0x1bf   :  { %v944_v43 = vpop.f32.mrf.mxu0 }
 0x1c0   :  { %v583_v52 = vadd.f32 %v944_v43, %v924_v42 }
 0x1c1   :  { %v574_v50 = vpop.f32.mrf.mxu0 }
 0x1c2   :  { %v575_v56 = vadd.f32 %v574_v50, %v477_v44 }
 0x1d3   :  { %v963_v46 = vpop.f32.mrf.mxu1 }
 0x1d4   :  { %v708_v49 = vadd.f32 %v963_v46, %v580_v45 }
 0x1d5   :  { %v691_v51 = vpop.f32.mrf.mxu1 }
 0x1d6   :  { %v719_v53 = vadd.f32 %v820_v47, %v708_v49  ;;  %v706_v54 = vadd.f32 %v691_v51, %v572_v48 }
 0x1d7   :  { %v964_v55 = vpop.f32.mrf.mxu1 }
 0x1d8   :  { %723 = vst.msk [vmem:[%s1194_s5 + $0x10] sm:$0xff] %vm21_vm0, %v719_v53  ;;  %v717_v57 = vadd.f32 %v820_v47, %v706_v54  ;;  %v709_v58 = vadd.f32 %v964_v55, %v583_v52 }
 0x1d9   :  { %v694_v59 = vpop.f32.mrf.mxu1 }
 0x1da   :  { %721 = vst.msk [vmem:[%s1194_s5] sm:$0xff] %vm21_vm0, %v717_v57  ;;  %v720_v60 = vadd.f32 %v820_v47, %v709_v58  ;;  %v707_v61 = vadd.f32 %v694_v59, %v575_v56 }
 0x1dc   :  { %724 = vst.msk [vmem:[%s1194_s5 + $0x18] sm:$0xff] %vm21_vm0, %v720_v60  ;;  %v718_v62 = vadd.f32 %v820_v47, %v707_v61 }
 0x1de   :  { %722 = vst.msk [vmem:[%s1194_s5 + $0x8] sm:$0xff] %vm21_vm0, %v718_v62 }

</bundles_post_ra>
